<compile_context>
chip_gen: v5e
topology: v5e:2x2
jax: 0.10.0
libtpu: 0.0.40
codegen_flags: <defaults>
</compile_context>

<pallas_src>
import math

import jax
import jax.numpy as jnp
from jax.experimental import pallas as pl
from jax.experimental.pallas import tpu as pltpu

_LANE = 128
_SUBLANE = 8
_SMALL_DISPATCH_BYTES = 256 << 10   # below this, plain x+pe (XLA fuses with neighbors)
_TWO_STEP_MIN_BYTES = 512 << 10     # above this, force >=2 row grid steps (v7x megacore)
_BLOCK_TARGET_BYTES = 2 << 20       # ~2 MiB blocks: near HBM roofline, v5e-VMEM-safe


def make_positional_encoding(d_model: int, max_len: int = 136,
                             dtype=jnp.float32) -> jnp.ndarray:
    """Sinusoidal table identical to the PyTorch __init__ (built in f32, cast ONCE)."""
    position = jnp.arange(0.0, max_len, dtype=jnp.float32)[:, None]            # (L, 1)
    div_term = jnp.exp(
        jnp.arange(0.0, d_model, 2.0, dtype=jnp.float32)
        * (-(math.log(10000.0) / d_model))
    )                                                                            # (D/2,)
    pe = jnp.zeros((max_len, d_model), dtype=jnp.float32)
    pe = pe.at[:, 0::2].set(jnp.sin(position * div_term))
    pe = pe.at[:, 1::2].set(jnp.cos(position * div_term))
    return pe[None, :, :].astype(dtype)                                          # (1, L, D)


def _add_pe_kernel(x_ref, pe_ref, o_ref):
    # Lane-dense tiles: x/o are (row_block, col_block); pe is (1, col_block) and is
    # sublane-broadcast on the VPU. col_block % 128 == 0 -> unmasked full-width vst.
    o_ref[...] = x_ref[...] + pe_ref[...]


def _choose_tiling(rows: int, cols: int, itemsize: int):
    """Byte-target tiling (cdiv grid, no divisor search). Returns (row_block, col_block)."""
    # Smallest row block we might end up using (used to bound the cols strip).
    base_rows = rows if rows < 2 * _SUBLANE else _SUBLANE

    # cols axis: tile only when even a base_rows-high strip exceeds the block target.
    if cols * itemsize * base_rows > _BLOCK_TARGET_BYTES and cols % _LANE == 0:
        col_block = max(_LANE,
                        (_BLOCK_TARGET_BYTES // (base_rows * itemsize)) // _LANE * _LANE)
        col_block = min(col_block, cols)
    else:
        col_block = cols

    total_bytes = rows * cols * itemsize
    if total_bytes <= _TWO_STEP_MIN_BYTES or rows < 2 * _SUBLANE:
        # Tiny slab: one block, one grid step (kills per-step pipeline overhead).
        row_block = rows
    else:
        strip_bytes = col_block * itemsize
        target_rows = max(_SUBLANE,
                          (_BLOCK_TARGET_BYTES // strip_bytes) // _SUBLANE * _SUBLANE)
        # >= 2 row steps so dimension_semantics=("parallel",...) shards across v7x's 2 TCs.
        two_step_cap = max(_SUBLANE, (rows // 2) // _SUBLANE * _SUBLANE)
        row_block = min(target_rows, two_step_cap)
    return row_block, col_block


def _add_pe_pallas(x2: jnp.ndarray, pe2: jnp.ndarray) -> jnp.ndarray:
    """x2 (rows, cols) + pe2 (1, cols), broadcast along rows, via pallas_call."""
    rows, cols = x2.shape
    itemsize = x2.dtype.itemsize

    # Pad the lane axis to a multiple of 128 so every store is a full-width vst.
    pad = (-cols) % _LANE
    if pad:
        x2 = jnp.pad(x2, ((0, 0), (0, pad)))
        pe2 = jnp.pad(pe2, ((0, 0), (0, pad)))
    cols_p = cols + pad

    row_block, col_block = _choose_tiling(rows, cols_p, itemsize)
    grid = (pl.cdiv(rows, row_block), pl.cdiv(cols_p, col_block))

    # Explicit scoped-VMEM budget: double-buffered x block + out block + pe row,
    # plus headroom. Stays well under v5e's 16 MiB default and v7x's 64 MiB physical.
    block_bytes = row_block * col_block * itemsize
    pe_bytes = col_block * itemsize
    vmem_limit = max(int(4 * block_bytes + 2 * pe_bytes + (4 << 20)), 8 << 20)

    out2 = pl.pallas_call(
        _add_pe_kernel,
        out_shape=jax.ShapeDtypeStruct((rows, cols_p), x2.dtype),
        grid=grid,
        in_specs=[
            pl.BlockSpec((row_block, col_block), lambda i, j: (i, j)),  # lane-dense x
            pl.BlockSpec((1, col_block), lambda i, j: (0, j)),          # resident pe row
        ],
        out_specs=pl.BlockSpec((row_block, col_block), lambda i, j: (i, j)),
        input_output_aliases={0: 0},        # in-place add: halves the HBM working set
        compiler_params=pltpu.CompilerParams(
            dimension_semantics=("parallel", "parallel"),
            vmem_limit_bytes=vmem_limit,
        ),
    )(x2, pe2)

    if pad:
        out2 = out2[:, :cols]
    return out2


def positional_encoding_forward(x: jnp.ndarray, pe: jnp.ndarray,
                                *, force_pallas: bool = False) -> jnp.ndarray:
    """out = dropout_{p=0}(x + pe[:, :x.shape[0]]) == x + pe[:, :x.shape[0]]."""
    s0 = x.shape[0]
    pe_slice = pe[:, :s0, :]                                    # static slice (cheap)
    if pe_slice.dtype != x.dtype:                               # normally a no-op: pe is
        pe_slice = pe_slice.astype(x.dtype)                     # built in x's dtype at init
    out_shape = jnp.broadcast_shapes(x.shape, pe_slice.shape)

    # Flatten to a lane-dense (rows, cols) slab with pe as a single (1, cols) row.
    if x.ndim == 2:
        # (N, D) + (1, N, D) -> (1, N, D): same-shape add with a leading 1 added.
        n, d = x.shape
        rows, cols = 1, n * d
        x2 = x.reshape(rows, cols)                              # free row-major view
        pe2 = pe_slice.reshape(1, cols)
    elif x.ndim == 3 and out_shape == x.shape:
        # (S, B, D) + (1, s0, D) -> (S, B, D): pe broadcast along the leading axis.
        s, b, d = x.shape
        if pe_slice.shape[1] != b:                              # s0 == 1 middle-dim case
            pe_slice = jnp.broadcast_to(pe_slice, (1, b, d))    # tiny table, cheap
        rows, cols = s, b * d
        x2 = x.reshape(rows, cols)                              # free row-major views
        pe2 = pe_slice.reshape(1, cols)
    else:
        # Expanding broadcast (e.g. B==1, S>1 -> (S, S, D)) or exotic rank: match
        # PyTorch exactly via plain XLA broadcasting; no bespoke Pallas tiling needed.
        return x + pe_slice

    # Highest-value lever at TQN's real shapes (~8 KiB inputs): the op is entirely
    # launch/latency-bound, so skip the standalone pallas_call and let XLA fuse the
    # add into the adjacent decoder matmul.
    # TODO(synk): fuse this +pe into the decoder matmul prologue at the module level.
    if not force_pallas and x2.size * x2.dtype.itemsize <= _SMALL_DISPATCH_BYTES:
        return (x2 + pe2).reshape(out_shape)

    return _add_pe_pallas(x2, pe2).reshape(out_shape)


if __name__ == "__main__":
    d_model = 32
    max_len = 136
    num_queries = 8
    seq = 8
    batch = 8          # batch == seq so the torch-style 3D broadcast is well-defined

    key = jax.random.PRNGKey(0)
    k2, k3, k4 = jax.random.split(key, 3)

    # pe built once, already in the activation dtype (cast hoisted out of forward).
    pe = make_positional_encoding(d_model, max_len, dtype=jnp.float32)

    # --- 2D case: (N, D), exactly how TQN.forward calls pos_encoder (Pallas path) ---
    x2 = jax.random.normal(k2, (num_queries, d_model), dtype=jnp.float32)
    out2 = jax.block_until_ready(positional_encoding_forward(x2, pe, force_pallas=True))
    ref2 = x2 + pe[:, : x2.shape[0], :]
    assert out2.shape == ref2.shape and out2.dtype == ref2.dtype
    assert jnp.allclose(out2, ref2, atol=1e-6, rtol=1e-6)

    # --- 3D case: (S, B, D), generic PyTorch broadcast with B == S (Pallas path) ---
    x3 = jax.random.normal(k3, (seq, batch, d_model), dtype=jnp.float32)
    out3 = jax.block_until_ready(positional_encoding_forward(x3, pe, force_pallas=True))
    ref3 = x3 + pe[:, : x3.shape[0], :]
    assert out3.shape == ref3.shape and out3.dtype == ref3.dtype
    assert jnp.allclose(out3, ref3, atol=1e-6, rtol=1e-6)

    # --- medium slab: exercises the multi-step row grid + auto dispatch to Pallas ---
    S = 128
    B = 128
    xm = jax.random.normal(k4, (S, B, d_model), dtype=jnp.float32)   # 2 MiB slab
    outm = jax.block_until_ready(positional_encoding_forward(xm, pe))
    refm = xm + pe[:, :S, :]
    assert outm.shape == refm.shape and outm.dtype == refm.dtype
    assert jnp.allclose(outm, refm, atol=1e-6, rtol=1e-6)

    # --- tiny-input auto dispatch: plain fused add path (the recommended default) ---
    outa = jax.block_until_ready(positional_encoding_forward(x2, pe))
    assert jnp.allclose(outa, ref2, atol=1e-6, rtol=1e-6)

    print("KERNEL_OK")
</pallas_src>

<mosaic_0001>
module attributes {stable_mosaic.version = 11 : i64} {
  func.func @_add_pe_kernel(%arg0: i32, %arg1: i32, %arg2: memref<1x256xf32, #tpu.memory_space<vmem>>, %arg3: memref<1x256xf32, #tpu.memory_space<vmem>>, %arg4: memref<1x256xf32, #tpu.memory_space<vmem>>) attributes {dimension_semantics = [#tpu.dimension_semantics<parallel>, #tpu.dimension_semantics<parallel>], iteration_bounds = array<i64: 1, 1>, scalar_prefetch = 0 : i64, scratch_operands = 0 : i64, tpu.core_type = #tpu.core_type<tc>, window_params = [{transform_indices = @transform_0, window_bounds = array<i64: 1, 256>}, {transform_indices = @transform_1, window_bounds = array<i64: 1, 256>}, {transform_indices = @transform_2, window_bounds = array<i64: 1, 256>}]} {
    %c0 = arith.constant 0 : index
    %c0_0 = arith.constant 0 : index
    %0 = vector.load %arg2[%c0, %c0_0] : memref<1x256xf32, #tpu.memory_space<vmem>>, vector<1x256xf32>
    %c0_1 = arith.constant 0 : index
    %c0_2 = arith.constant 0 : index
    %1 = vector.load %arg3[%c0_1, %c0_2] : memref<1x256xf32, #tpu.memory_space<vmem>>, vector<1x256xf32>
    %2 = arith.addf %0, %1 : vector<1x256xf32>
    %c0_3 = arith.constant 0 : index
    %c0_4 = arith.constant 0 : index
    %3 = vector.load %arg4[%c0_3, %c0_4] : memref<1x256xf32, #tpu.memory_space<vmem>>, vector<1x256xf32>
    tpu.vector_store %arg4[%c0_3, %c0_4], %2 {strides = array<i32>} : memref<1x256xf32, #tpu.memory_space<vmem>>, vector<1x256xf32>,
    return
  }
  func.func @transform_0(%arg0: i32, %arg1: i32) -> (i32, i32) {
    %c0_i32 = arith.constant 0 : i32
    return %arg0, %arg1 : i32, i32
  }
  func.func @transform_1(%arg0: i32, %arg1: i32) -> (i32, i32) {
    %c0_i32 = arith.constant 0 : i32
    %c0_i32_0 = arith.constant 0 : i32
    return %c0_i32, %arg1 : i32, i32
  }
  func.func @transform_2(%arg0: i32, %arg1: i32) -> (i32, i32) {
    %c0_i32 = arith.constant 0 : i32
    return %arg0, %arg1 : i32, i32
  }
}

</mosaic_0001>

<bundles_post_ra>
// kernel: tpu_custom_call.1
= control target key start
LH: loop header
LB: loop body
LE: loop exit
PB: predicated region body
PF: predicated region fallthrough
CT: control target
= control target key end

     0   :  { %7 = vsyncpa [#allocation3], 0  ;;  %s131_s0 = inlined_call_operand.hbm [shape: f32[1,256], index: 0, kind: input, shape index: {}, may-alias: {0,2}]   ;;  %s132_s1 = inlined_call_operand.vmem [shape: f32[1,256], index: 1, kind: input, shape index: {}]   ;;  %s133_s2 = inlined_call_operand.hbm [shape: f32[1,256], index: 2, kind: output, shape index: {}, may-alias: {0,2}]  }
   0x1   :  { %8 = vsyncpa [#allocation4], 0  ;;  %s14_s11 = sshll.u32 %s131_s0, 4  ;;  %s105_s12 = smov [#allocation2]   ;;  %s15_s11 = int_to_ptr.hbm [resolvable:$true] %s14_s11 }
   0x2   :  { %s16_s13 = sshll.u32 %s105_s12, 4  ;;  %s17_s13 = int_to_ptr.vmem [resolvable:$true] %s16_s13 }
   0x3   :  { %19 = dma.hbm_to_vmem [thread:$0]  %s15_s11, 32, %s17_s13, [#allocation3]  }
   0x4   :  { %101 = dma.done.wait [#allocation3], 32  }
   0x5   :  { %102 = vsyncadd [#allocation3], 4294967264  ;;  %v29_v0 = vlaneseq  ;;  %s106_s14 = smov [#allocation5]   ;;  %s41_s18 = sshll.u32 %s133_s2, 4  ;;  %v26_v1 = vld [vmem:[#allocation2] sm:$0x3]  ;;  %s42_s18 = int_to_ptr.hbm [resolvable:$true] %s41_s18 }
   0x6   :  { %s39_s15 = sshll.u32 %s106_s14, 4  ;;  %v27_v2 = vld [vmem:[%s132_s1] sm:$0x3]  ;;  %s40_s15 = int_to_ptr.vmem [resolvable:$true] %s39_s15 }
   0x7   :  { %vm31_vm0 = vcmp.lt.s32.totalorder %v29_v0, 256  ;;  %v28_v3 = vadd.f32 %v27_v2, %v26_v1 }
   0x9   :  { %33 = vst.msk [vmem:[#allocation5] sm:$0x3] %vm31_vm0, %v28_v3 }
   0xa   :  { %44 = dma.vmem_to_hbm [thread:$0]  %s40_s15, 32, %s42_s18, [#allocation4]  }
   0xb   :  { %103 = dma.done.wait [#allocation4], 32  }
   0xc   :  { %104 = vsyncadd [#allocation4], 4294967264 }
   0xd   :  { %49 = vsyncpa [#allocation3], 1 }
   0xe   :  { %50 = vsyncpa [#allocation4], 1 }

</bundles_post_ra>
